<compile_context>
chip_gen: v7x
topology: tpu7x:2x2x1
jax: 0.10.0
libtpu: 0.0.40
codegen_flags: <defaults>
</compile_context>

<pallas_src>
import functools

import jax
import jax.numpy as jnp
from jax.experimental import pallas as pl
from jax.experimental.pallas import tpu as pltpu


def _round_up(x, m):
    return ((x + m - 1) // m) * m


def _mlp_large_kernel(
    ms_ref, ps_ref,
    w_ms, b_ms, w_ps, b_ps,
    w_enc_m2, b_enc_m2,
    w_enc_3x, w_enc_3y, b_enc_3,
    w_enc_4, b_enc_4,
    w_pol_e1, b_pol_e1,
    w_pol_2x, w_pol_2y, w_pol_2z, b_pol_2,
    w_pol_3, b_pol_3,
    w_pol_4, b_pol_4,
    out_ref,
    *, hp,
):
    relu = lambda v: jnp.maximum(v, 0.0)

    def dot(a, w_ref):
        # Cast the activation operand to the weight dtype (bf16) right before
        # the MXU push; accumulation stays f32.
        return jnp.dot(a.astype(w_ref.dtype), w_ref[...],
                       preferred_element_type=jnp.float32)

    ms = ms_ref[...]
    ps = ps_ref[...]

    # ---- fused input layers ----
    # [fc_enc_m1 | fc_pol_m1(scattered)] on market_states, one wide matmul.
    msw = relu(dot(ms, w_ms) + b_ms[...])          # (TB, 2*hp)
    x1, pz = msw[:, :hp], msw[:, hp:]              # 128-aligned split
    # [fc_enc_p1 | fc_pol_p1] on private_states, one wide matmul.
    psw = relu(dot(ps, w_ps) + b_ps[...])          # (TB, 2*hp)
    y, py = psw[:, :hp], psw[:, hp:]

    # ---- encoder ----
    x = relu(dot(x1, w_enc_m2) + b_enc_m2[...])
    # fc_enc_3 on cat((x, y), 1)  ==  x @ W[:h] + y @ W[h:]
    z = relu(dot(x, w_enc_3x) + dot(y, w_enc_3y) + b_enc_3[...])
    emb = dot(z, w_enc_4) + b_enc_4[...]
    # detach=True is a no-op for the forward values (only affects autograd).

    # ---- policy head ----
    px = relu(dot(emb, w_pol_e1) + b_pol_e1[...])
    # fc_pol_2 on cat((px, py, pz), 1)
    o = relu(dot(px, w_pol_2x) + dot(py, w_pol_2y) + dot(pz, w_pol_2z)
             + b_pol_2[...])
    o = relu(dot(o, w_pol_3) + b_pol_3[...])
    out_ref[...] = dot(o, w_pol_4) + b_pol_4[...]  # lane-dense (TB, 128k) store


def mlp_network_large_forward(market_states, private_states, params,
                              market_state3_indices, *,
                              block_batch=512,
                              weight_dtype=jnp.bfloat16):
    """Pallas forward of MLPNetworkLarge (batch-tiled, resident weights)."""
    batch, dim_input1 = market_states.shape
    dim_input2 = private_states.shape[1]
    hidden = params["w_enc_m1"].shape[1]
    dim_embedding = params["w_enc_4"].shape[1]
    dim_output = params["w_pol_4"].shape[1]

    # Lane-padded feature dims (zero padding is algebraically exact: padded
    # hidden units get zero weights + zero bias and feed zero weight rows).
    HP = _round_up(hidden, 128)
    EP = _round_up(dim_embedding, 128)
    OP = _round_up(dim_output, 128)

    def pad2(a, rows, cols):
        return jnp.pad(a, ((0, rows - a.shape[0]), (0, cols - a.shape[1])))

    # Fold the static column gather into fc_pol_m1's weight:
    # ms3 @ W  ==  ms @ W'  with W'[idx[j]] += W[j]  (add handles dup indices).
    idx = jnp.asarray(market_state3_indices, dtype=jnp.int32)
    w_pol_m1_full = jnp.zeros((dim_input1, hidden), params["w_pol_m1"].dtype)
    w_pol_m1_full = w_pol_m1_full.at[idx].add(params["w_pol_m1"])

    # Fuse sibling layers that share an input along the N axis.
    w_ms = jnp.concatenate([pad2(params["w_enc_m1"], dim_input1, HP),
                            pad2(w_pol_m1_full, dim_input1, HP)], axis=1)
    b_ms = jnp.concatenate([pad2(params["b_enc_m1"], 1, HP),
                            pad2(params["b_pol_m1"], 1, HP)], axis=1)
    w_ps = jnp.concatenate([pad2(params["w_enc_p1"], dim_input2, HP),
                            pad2(params["w_pol_p1"], dim_input2, HP)], axis=1)
    b_ps = jnp.concatenate([pad2(params["b_enc_p1"], 1, HP),
                            pad2(params["b_pol_p1"], 1, HP)], axis=1)

    # Split the concatenated-input weight matrices (no concat in-kernel).
    w_enc_3 = params["w_enc_3"]
    w_pol_2 = params["w_pol_2"]
    weights = dict(
        w_ms=w_ms, w_ps=w_ps,
        w_enc_m2=pad2(params["w_enc_m2"], HP, HP),
        w_enc_3x=pad2(w_enc_3[:hidden], HP, HP),
        w_enc_3y=pad2(w_enc_3[hidden:], HP, HP),
        w_enc_4=pad2(params["w_enc_4"], HP, EP),
        w_pol_e1=pad2(params["w_pol_e1"], EP, HP),
        w_pol_2x=pad2(w_pol_2[:hidden], HP, HP),
        w_pol_2y=pad2(w_pol_2[hidden:2 * hidden], HP, HP),
        w_pol_2z=pad2(w_pol_2[2 * hidden:], HP, HP),
        w_pol_3=pad2(params["w_pol_3"], HP, HP),
        w_pol_4=pad2(params["w_pol_4"], HP, OP),
    )
    biases = dict(
        b_ms=b_ms, b_ps=b_ps,
        b_enc_m2=pad2(params["b_enc_m2"], 1, HP),
        b_enc_3=pad2(params["b_enc_3"], 1, HP),
        b_enc_4=pad2(params["b_enc_4"], 1, EP),
        b_pol_e1=pad2(params["b_pol_e1"], 1, HP),
        b_pol_2=pad2(params["b_pol_2"], 1, HP),
        b_pol_3=pad2(params["b_pol_3"], 1, HP),
        b_pol_4=pad2(params["b_pol_4"], 1, OP),
    )
    weights = {k: v.astype(weight_dtype) for k, v in weights.items()}
    biases = {k: v.astype(jnp.float32) for k, v in biases.items()}

    # Batch tiling: big tiles when the batch is big, one small tile otherwise.
    TB = _round_up(min(block_batch, _round_up(batch, 8)), 8)
    padded_batch = _round_up(batch, TB)
    grid = (padded_batch // TB,)

    ms_in = market_states.astype(jnp.float32)
    ps_in = private_states.astype(jnp.float32)
    if padded_batch != batch:
        pad_rows = padded_batch - batch
        ms_in = jnp.pad(ms_in, ((0, pad_rows), (0, 0)))
        ps_in = jnp.pad(ps_in, ((0, pad_rows), (0, 0)))

    w, b = weights, biases
    const_inputs = [
        w["w_ms"], b["b_ms"], w["w_ps"], b["b_ps"],
        w["w_enc_m2"], b["b_enc_m2"],
        w["w_enc_3x"], w["w_enc_3y"], b["b_enc_3"],
        w["w_enc_4"], b["b_enc_4"],
        w["w_pol_e1"], b["b_pol_e1"],
        w["w_pol_2x"], w["w_pol_2y"], w["w_pol_2z"], b["b_pol_2"],
        w["w_pol_3"], b["b_pol_3"],
        w["w_pol_4"], b["b_pol_4"],
    ]
    in_specs = (
        [pl.BlockSpec((TB, dim_input1), lambda i: (i, 0)),
         pl.BlockSpec((TB, dim_input2), lambda i: (i, 0))]
        # Weights/biases: full-array blocks, constant index_map -> VMEM-resident.
        + [pl.BlockSpec(a.shape, lambda i: (0, 0)) for a in const_inputs]
    )
    kernel_inputs = [ms_in, ps_in] + const_inputs

    out_padded = pl.pallas_call(
        functools.partial(_mlp_large_kernel, hp=HP),
        out_shape=jax.ShapeDtypeStruct((padded_batch, OP), jnp.float32),
        grid=grid,
        in_specs=in_specs,
        out_specs=pl.BlockSpec((TB, OP), lambda i: (i, 0)),
        compiler_params=pltpu.CompilerParams(
            dimension_semantics=("parallel",),      # v7x: shard batch over 2 TCs
            vmem_limit_bytes=48 * 1024 * 1024),     # headroom vs v7x 64 MiB
    )(*kernel_inputs)

    return out_padded[:batch, :dim_output]


# ---------------------------------------------------------------------------
# Deterministic parameter init (PyTorch nn.Linear-style uniform bounds).
# ---------------------------------------------------------------------------
def _init_linear(key, fan_in, fan_out):
    kw, kb = jax.random.split(key)
    bound = 1.0 / jnp.sqrt(fan_in)
    w = jax.random.uniform(kw, (fan_in, fan_out), jnp.float32, -bound, bound)
    b = jax.random.uniform(kb, (1, fan_out), jnp.float32, -bound, bound)
    return w, b


def make_params(key, dim_input1, dim_input2, dim_input3, dim_embedding,
                dim_output, hidden):
    names_shapes = [
        ("enc_m1", dim_input1, hidden),
        ("enc_m2", hidden, hidden),
        ("enc_p1", dim_input2, hidden),
        ("enc_3", 2 * hidden, hidden),
        ("enc_4", hidden, dim_embedding),
        ("pol_e1", dim_embedding, hidden),
        ("pol_p1", dim_input2, hidden),
        ("pol_m1", dim_input3, hidden),
        ("pol_2", 3 * hidden, hidden),
        ("pol_3", hidden, hidden),
        ("pol_4", hidden, dim_output),
    ]
    params = {}
    keys = jax.random.split(key, len(names_shapes))
    for k, (name, fi, fo) in zip(keys, names_shapes):
        wt, bs = _init_linear(k, fi, fo)
        params[f"w_{name}"] = wt
        params[f"b_{name}"] = bs
    return params


# ---------------------------------------------------------------------------
# Plain-JAX reference (mirrors the PyTorch forward) for validation.
# ---------------------------------------------------------------------------
def reference_forward(market_states, private_states, params, indices):
    relu = jax.nn.relu
    p = params
    x = relu(market_states @ p["w_enc_m1"] + p["b_enc_m1"])
    x = relu(x @ p["w_enc_m2"] + p["b_enc_m2"])
    y = relu(private_states @ p["w_enc_p1"] + p["b_enc_p1"])
    z = jnp.concatenate([x, y], axis=1)
    z = relu(z @ p["w_enc_3"] + p["b_enc_3"])
    emb = z @ p["w_enc_4"] + p["b_enc_4"]

    px = relu(emb @ p["w_pol_e1"] + p["b_pol_e1"])
    py = relu(private_states @ p["w_pol_p1"] + p["b_pol_p1"])
    ms3 = market_states[:, jnp.asarray(indices)]
    pz = relu(ms3 @ p["w_pol_m1"] + p["b_pol_m1"])
    out = jnp.concatenate([px, py, pz], axis=1)
    out = relu(out @ p["w_pol_2"] + p["b_pol_2"])
    out = relu(out @ p["w_pol_3"] + p["b_pol_3"])
    return out @ p["w_pol_4"] + p["b_pol_4"]


if __name__ == "__main__":
    # Small shapes consistent with the module's forward signature.
    batch = 8
    dim_input1 = 16     # market_states features
    dim_input2 = 8      # private_states features
    dim_embedding = 32
    dim_output = 4
    hidden = 32
    market_state3_indices = (0, 2, 4, 6, 8, 10)   # dim_input3 = 6

    key = jax.random.PRNGKey(0)
    k_ms, k_ps, k_params = jax.random.split(key, 3)
    market_states = jax.random.normal(k_ms, (batch, dim_input1), jnp.float32)
    private_states = jax.random.normal(k_ps, (batch, dim_input2), jnp.float32)

    params = make_params(k_params, dim_input1, dim_input2,
                         len(market_state3_indices), dim_embedding,
                         dim_output, hidden)

    fwd = jax.jit(functools.partial(
        mlp_network_large_forward,
        market_state3_indices=market_state3_indices))
    out = jax.block_until_ready(fwd(market_states, private_states, params))

    ref = reference_forward(market_states, private_states, params,
                            market_state3_indices)
    assert out.shape == (batch, dim_output)
    max_diff = float(jnp.max(jnp.abs(out - ref)))
    # bf16 weights => loosened tolerance vs the f32 reference.
    assert jnp.allclose(out, ref, rtol=5e-2, atol=5e-2), (
        f"mismatch: max abs diff {max_diff}")

    print("KERNEL_OK")
</pallas_src>

<mosaic_0001>
module attributes {stable_mosaic.version = 11 : i64} {
  func.func @_mlp_large_kernel(%arg0: i32, %arg1: memref<8x16xf32, #tpu.memory_space<vmem>>, %arg2: memref<8x8xf32, #tpu.memory_space<vmem>>, %arg3: memref<16x256xbf16, #tpu.memory_space<vmem>>, %arg4: memref<1x256xf32, #tpu.memory_space<vmem>>, %arg5: memref<8x256xbf16, #tpu.memory_space<vmem>>, %arg6: memref<1x256xf32, #tpu.memory_space<vmem>>, %arg7: memref<128x128xbf16, #tpu.memory_space<vmem>>, %arg8: memref<1x128xf32, #tpu.memory_space<vmem>>, %arg9: memref<128x128xbf16, #tpu.memory_space<vmem>>, %arg10: memref<128x128xbf16, #tpu.memory_space<vmem>>, %arg11: memref<1x128xf32, #tpu.memory_space<vmem>>, %arg12: memref<128x128xbf16, #tpu.memory_space<vmem>>, %arg13: memref<1x128xf32, #tpu.memory_space<vmem>>, %arg14: memref<128x128xbf16, #tpu.memory_space<vmem>>, %arg15: memref<1x128xf32, #tpu.memory_space<vmem>>, %arg16: memref<128x128xbf16, #tpu.memory_space<vmem>>, %arg17: memref<128x128xbf16, #tpu.memory_space<vmem>>, %arg18: memref<128x128xbf16, #tpu.memory_space<vmem>>, %arg19: memref<1x128xf32, #tpu.memory_space<vmem>>, %arg20: memref<128x128xbf16, #tpu.memory_space<vmem>>, %arg21: memref<1x128xf32, #tpu.memory_space<vmem>>, %arg22: memref<128x128xbf16, #tpu.memory_space<vmem>>, %arg23: memref<1x128xf32, #tpu.memory_space<vmem>>, %arg24: memref<8x128xf32, #tpu.memory_space<vmem>>) attributes {dimension_semantics = [#tpu.dimension_semantics<parallel>], iteration_bounds = array<i64: 1>, scalar_prefetch = 0 : i64, scratch_operands = 0 : i64, tpu.core_type = #tpu.core_type<tc>, window_params = [{transform_indices = @transform_0, window_bounds = array<i64: 8, 16>}, {transform_indices = @transform_1, window_bounds = array<i64: 8, 8>}, {pipeline_mode = #tpu.pipeline_mode<synchronous>, transform_indices = @transform_2, window_bounds = array<i64: 16, 256>}, {pipeline_mode = #tpu.pipeline_mode<synchronous>, transform_indices = @transform_3, window_bounds = array<i64: 1, 256>}, {pipeline_mode = #tpu.pipeline_mode<synchronous>, transform_indices = @transform_4, window_bounds = array<i64: 8, 256>}, {pipeline_mode = #tpu.pipeline_mode<synchronous>, transform_indices = @transform_5, window_bounds = array<i64: 1, 256>}, {pipeline_mode = #tpu.pipeline_mode<synchronous>, transform_indices = @transform_6, window_bounds = array<i64: 128, 128>}, {pipeline_mode = #tpu.pipeline_mode<synchronous>, transform_indices = @transform_7, window_bounds = array<i64: 1, 128>}, {pipeline_mode = #tpu.pipeline_mode<synchronous>, transform_indices = @transform_8, window_bounds = array<i64: 128, 128>}, {pipeline_mode = #tpu.pipeline_mode<synchronous>, transform_indices = @transform_9, window_bounds = array<i64: 128, 128>}, {pipeline_mode = #tpu.pipeline_mode<synchronous>, transform_indices = @transform_10, window_bounds = array<i64: 1, 128>}, {pipeline_mode = #tpu.pipeline_mode<synchronous>, transform_indices = @transform_11, window_bounds = array<i64: 128, 128>}, {pipeline_mode = #tpu.pipeline_mode<synchronous>, transform_indices = @transform_12, window_bounds = array<i64: 1, 128>}, {pipeline_mode = #tpu.pipeline_mode<synchronous>, transform_indices = @transform_13, window_bounds = array<i64: 128, 128>}, {pipeline_mode = #tpu.pipeline_mode<synchronous>, transform_indices = @transform_14, window_bounds = array<i64: 1, 128>}, {pipeline_mode = #tpu.pipeline_mode<synchronous>, transform_indices = @transform_15, window_bounds = array<i64: 128, 128>}, {pipeline_mode = #tpu.pipeline_mode<synchronous>, transform_indices = @transform_16, window_bounds = array<i64: 128, 128>}, {pipeline_mode = #tpu.pipeline_mode<synchronous>, transform_indices = @transform_17, window_bounds = array<i64: 128, 128>}, {pipeline_mode = #tpu.pipeline_mode<synchronous>, transform_indices = @transform_18, window_bounds = array<i64: 1, 128>}, {pipeline_mode = #tpu.pipeline_mode<synchronous>, transform_indices = @transform_19, window_bounds = array<i64: 128, 128>}, {pipeline_mode = #tpu.pipeline_mode<synchronous>, transform_indices = @transform_20, window_bounds = array<i64: 1, 128>}, {pipeline_mode = #tpu.pipeline_mode<synchronous>, transform_indices = @transform_21, window_bounds = array<i64: 128, 128>}, {pipeline_mode = #tpu.pipeline_mode<synchronous>, transform_indices = @transform_22, window_bounds = array<i64: 1, 128>}, {transform_indices = @transform_23, window_bounds = array<i64: 8, 128>}]} {
    %c0 = arith.constant 0 : index
    %c0_0 = arith.constant 0 : index
    %0 = vector.load %arg1[%c0, %c0_0] : memref<8x16xf32, #tpu.memory_space<vmem>>, vector<8x16xf32>
    %c0_1 = arith.constant 0 : index
    %c0_2 = arith.constant 0 : index
    %1 = vector.load %arg2[%c0_1, %c0_2] : memref<8x8xf32, #tpu.memory_space<vmem>>, vector<8x8xf32>
    %2 = arith.truncf %0 : vector<8x16xf32> to vector<8x16xbf16>
    %c0_3 = arith.constant 0 : index
    %c0_4 = arith.constant 0 : index
    %3 = vector.load %arg3[%c0_3, %c0_4] : memref<16x256xbf16, #tpu.memory_space<vmem>>, vector<16x256xbf16>
    %cst = arith.constant dense<0.000000e+00> : vector<8x256xf32>
    %4 = tpu.matmul %2, %3, %cst {dimension_numbers = #tpu.dot_dimension_numbers<[1], [0], [0], [1], [0, 0, 1, 1], [], []>} : vector<8x16xbf16>, vector<16x256xbf16>, vector<8x256xf32> -> vector<8x256xf32>
    %c0_5 = arith.constant 0 : index
    %c0_6 = arith.constant 0 : index
    %5 = vector.load %arg4[%c0_5, %c0_6] : memref<1x256xf32, #tpu.memory_space<vmem>>, vector<1x256xf32>
    %6 = vector.broadcast %5 : vector<1x256xf32> to vector<8x256xf32>
    %7 = arith.addf %4, %6 : vector<8x256xf32>
    %cst_7 = arith.constant 0.000000e+00 : f32
    %8 = vector.broadcast %cst_7 : f32 to vector<8x256xf32>
    %9 = arith.maximumf %7, %8 : vector<8x256xf32>
    %10 = vector.extract_strided_slice %9 {offsets = [0, 0], sizes = [8, 128], strides = [1, 1]} : vector<8x256xf32> to vector<8x128xf32>
    %11 = vector.extract_strided_slice %9 {offsets = [0, 128], sizes = [8, 128], strides = [1, 1]} : vector<8x256xf32> to vector<8x128xf32>
    %12 = arith.truncf %1 : vector<8x8xf32> to vector<8x8xbf16>
    %c0_8 = arith.constant 0 : index
    %c0_9 = arith.constant 0 : index
    %13 = vector.load %arg5[%c0_8, %c0_9] : memref<8x256xbf16, #tpu.memory_space<vmem>>, vector<8x256xbf16>
    %cst_10 = arith.constant dense<0.000000e+00> : vector<8x256xf32>
    %14 = tpu.matmul %12, %13, %cst_10 {dimension_numbers = #tpu.dot_dimension_numbers<[1], [0], [0], [1], [0, 0, 1, 1], [], []>} : vector<8x8xbf16>, vector<8x256xbf16>, vector<8x256xf32> -> vector<8x256xf32>
    %c0_11 = arith.constant 0 : index
    %c0_12 = arith.constant 0 : index
    %15 = vector.load %arg6[%c0_11, %c0_12] : memref<1x256xf32, #tpu.memory_space<vmem>>, vector<1x256xf32>
    %16 = vector.broadcast %15 : vector<1x256xf32> to vector<8x256xf32>
    %17 = arith.addf %14, %16 : vector<8x256xf32>
    %cst_13 = arith.constant 0.000000e+00 : f32
    %18 = vector.broadcast %cst_13 : f32 to vector<8x256xf32>
    %19 = arith.maximumf %17, %18 : vector<8x256xf32>
    %20 = vector.extract_strided_slice %19 {offsets = [0, 0], sizes = [8, 128], strides = [1, 1]} : vector<8x256xf32> to vector<8x128xf32>
    %21 = vector.extract_strided_slice %19 {offsets = [0, 128], sizes = [8, 128], strides = [1, 1]} : vector<8x256xf32> to vector<8x128xf32>
    %22 = arith.truncf %10 : vector<8x128xf32> to vector<8x128xbf16>
    %c0_14 = arith.constant 0 : index
    %c0_15 = arith.constant 0 : index
    %23 = vector.load %arg7[%c0_14, %c0_15] : memref<128x128xbf16, #tpu.memory_space<vmem>>, vector<128x128xbf16>
    %cst_16 = arith.constant dense<0.000000e+00> : vector<8x128xf32>
    %24 = tpu.matmul %22, %23, %cst_16 {dimension_numbers = #tpu.dot_dimension_numbers<[1], [0], [0], [1], [0, 0, 1, 1], [], []>} : vector<8x128xbf16>, vector<128x128xbf16>, vector<8x128xf32> -> vector<8x128xf32>
    %c0_17 = arith.constant 0 : index
    %c0_18 = arith.constant 0 : index
    %25 = vector.load %arg8[%c0_17, %c0_18] : memref<1x128xf32, #tpu.memory_space<vmem>>, vector<1x128xf32>
    %26 = vector.broadcast %25 : vector<1x128xf32> to vector<8x128xf32>
    %27 = arith.addf %24, %26 : vector<8x128xf32>
    %cst_19 = arith.constant 0.000000e+00 : f32
    %28 = vector.broadcast %cst_19 : f32 to vector<8x128xf32>
    %29 = arith.maximumf %27, %28 : vector<8x128xf32>
    %30 = arith.truncf %29 : vector<8x128xf32> to vector<8x128xbf16>
    %c0_20 = arith.constant 0 : index
    %c0_21 = arith.constant 0 : index
    %31 = vector.load %arg9[%c0_20, %c0_21] : memref<128x128xbf16, #tpu.memory_space<vmem>>, vector<128x128xbf16>
    %cst_22 = arith.constant dense<0.000000e+00> : vector<8x128xf32>
    %32 = tpu.matmul %30, %31, %cst_22 {dimension_numbers = #tpu.dot_dimension_numbers<[1], [0], [0], [1], [0, 0, 1, 1], [], []>} : vector<8x128xbf16>, vector<128x128xbf16>, vector<8x128xf32> -> vector<8x128xf32>
    %33 = arith.truncf %20 : vector<8x128xf32> to vector<8x128xbf16>
    %c0_23 = arith.constant 0 : index
    %c0_24 = arith.constant 0 : index
    %34 = vector.load %arg10[%c0_23, %c0_24] : memref<128x128xbf16, #tpu.memory_space<vmem>>, vector<128x128xbf16>
    %cst_25 = arith.constant dense<0.000000e+00> : vector<8x128xf32>
    %35 = tpu.matmul %33, %34, %cst_25 {dimension_numbers = #tpu.dot_dimension_numbers<[1], [0], [0], [1], [0, 0, 1, 1], [], []>} : vector<8x128xbf16>, vector<128x128xbf16>, vector<8x128xf32> -> vector<8x128xf32>
    %36 = arith.addf %32, %35 : vector<8x128xf32>
    %c0_26 = arith.constant 0 : index
    %c0_27 = arith.constant 0 : index
    %37 = vector.load %arg11[%c0_26, %c0_27] : memref<1x128xf32, #tpu.memory_space<vmem>>, vector<1x128xf32>
    %38 = vector.broadcast %37 : vector<1x128xf32> to vector<8x128xf32>
    %39 = arith.addf %36, %38 : vector<8x128xf32>
    %cst_28 = arith.constant 0.000000e+00 : f32
    %40 = vector.broadcast %cst_28 : f32 to vector<8x128xf32>
    %41 = arith.maximumf %39, %40 : vector<8x128xf32>
    %42 = arith.truncf %41 : vector<8x128xf32> to vector<8x128xbf16>
    %c0_29 = arith.constant 0 : index
    %c0_30 = arith.constant 0 : index
    %43 = vector.load %arg12[%c0_29, %c0_30] : memref<128x128xbf16, #tpu.memory_space<vmem>>, vector<128x128xbf16>
    %cst_31 = arith.constant dense<0.000000e+00> : vector<8x128xf32>
    %44 = tpu.matmul %42, %43, %cst_31 {dimension_numbers = #tpu.dot_dimension_numbers<[1], [0], [0], [1], [0, 0, 1, 1], [], []>} : vector<8x128xbf16>, vector<128x128xbf16>, vector<8x128xf32> -> vector<8x128xf32>
    %c0_32 = arith.constant 0 : index
    %c0_33 = arith.constant 0 : index
    %45 = vector.load %arg13[%c0_32, %c0_33] : memref<1x128xf32, #tpu.memory_space<vmem>>, vector<1x128xf32>
    %46 = vector.broadcast %45 : vector<1x128xf32> to vector<8x128xf32>
    %47 = arith.addf %44, %46 : vector<8x128xf32>
    %48 = arith.truncf %47 : vector<8x128xf32> to vector<8x128xbf16>
    %c0_34 = arith.constant 0 : index
    %c0_35 = arith.constant 0 : index
    %49 = vector.load %arg14[%c0_34, %c0_35] : memref<128x128xbf16, #tpu.memory_space<vmem>>, vector<128x128xbf16>
    %cst_36 = arith.constant dense<0.000000e+00> : vector<8x128xf32>
    %50 = tpu.matmul %48, %49, %cst_36 {dimension_numbers = #tpu.dot_dimension_numbers<[1], [0], [0], [1], [0, 0, 1, 1], [], []>} : vector<8x128xbf16>, vector<128x128xbf16>, vector<8x128xf32> -> vector<8x128xf32>
    %c0_37 = arith.constant 0 : index
    %c0_38 = arith.constant 0 : index
    %51 = vector.load %arg15[%c0_37, %c0_38] : memref<1x128xf32, #tpu.memory_space<vmem>>, vector<1x128xf32>
    %52 = vector.broadcast %51 : vector<1x128xf32> to vector<8x128xf32>
    %53 = arith.addf %50, %52 : vector<8x128xf32>
    %cst_39 = arith.constant 0.000000e+00 : f32
    %54 = vector.broadcast %cst_39 : f32 to vector<8x128xf32>
    %55 = arith.maximumf %53, %54 : vector<8x128xf32>
    %56 = arith.truncf %55 : vector<8x128xf32> to vector<8x128xbf16>
    %c0_40 = arith.constant 0 : index
    %c0_41 = arith.constant 0 : index
    %57 = vector.load %arg16[%c0_40, %c0_41] : memref<128x128xbf16, #tpu.memory_space<vmem>>, vector<128x128xbf16>
    %cst_42 = arith.constant dense<0.000000e+00> : vector<8x128xf32>
    %58 = tpu.matmul %56, %57, %cst_42 {dimension_numbers = #tpu.dot_dimension_numbers<[1], [0], [0], [1], [0, 0, 1, 1], [], []>} : vector<8x128xbf16>, vector<128x128xbf16>, vector<8x128xf32> -> vector<8x128xf32>
    %59 = arith.truncf %21 : vector<8x128xf32> to vector<8x128xbf16>
    %c0_43 = arith.constant 0 : index
    %c0_44 = arith.constant 0 : index
    %60 = vector.load %arg17[%c0_43, %c0_44] : memref<128x128xbf16, #tpu.memory_space<vmem>>, vector<128x128xbf16>
    %cst_45 = arith.constant dense<0.000000e+00> : vector<8x128xf32>
    %61 = tpu.matmul %59, %60, %cst_45 {dimension_numbers = #tpu.dot_dimension_numbers<[1], [0], [0], [1], [0, 0, 1, 1], [], []>} : vector<8x128xbf16>, vector<128x128xbf16>, vector<8x128xf32> -> vector<8x128xf32>
    %62 = arith.addf %58, %61 : vector<8x128xf32>
    %63 = arith.truncf %11 : vector<8x128xf32> to vector<8x128xbf16>
    %c0_46 = arith.constant 0 : index
    %c0_47 = arith.constant 0 : index
    %64 = vector.load %arg18[%c0_46, %c0_47] : memref<128x128xbf16, #tpu.memory_space<vmem>>, vector<128x128xbf16>
    %cst_48 = arith.constant dense<0.000000e+00> : vector<8x128xf32>
    %65 = tpu.matmul %63, %64, %cst_48 {dimension_numbers = #tpu.dot_dimension_numbers<[1], [0], [0], [1], [0, 0, 1, 1], [], []>} : vector<8x128xbf16>, vector<128x128xbf16>, vector<8x128xf32> -> vector<8x128xf32>
    %66 = arith.addf %62, %65 : vector<8x128xf32>
    %c0_49 = arith.constant 0 : index
    %c0_50 = arith.constant 0 : index
    %67 = vector.load %arg19[%c0_49, %c0_50] : memref<1x128xf32, #tpu.memory_space<vmem>>, vector<1x128xf32>
    %68 = vector.broadcast %67 : vector<1x128xf32> to vector<8x128xf32>
    %69 = arith.addf %66, %68 : vector<8x128xf32>
    %cst_51 = arith.constant 0.000000e+00 : f32
    %70 = vector.broadcast %cst_51 : f32 to vector<8x128xf32>
    %71 = arith.maximumf %69, %70 : vector<8x128xf32>
    %72 = arith.truncf %71 : vector<8x128xf32> to vector<8x128xbf16>
    %c0_52 = arith.constant 0 : index
    %c0_53 = arith.constant 0 : index
    %73 = vector.load %arg20[%c0_52, %c0_53] : memref<128x128xbf16, #tpu.memory_space<vmem>>, vector<128x128xbf16>
    %cst_54 = arith.constant dense<0.000000e+00> : vector<8x128xf32>
    %74 = tpu.matmul %72, %73, %cst_54 {dimension_numbers = #tpu.dot_dimension_numbers<[1], [0], [0], [1], [0, 0, 1, 1], [], []>} : vector<8x128xbf16>, vector<128x128xbf16>, vector<8x128xf32> -> vector<8x128xf32>
    %c0_55 = arith.constant 0 : index
    %c0_56 = arith.constant 0 : index
    %75 = vector.load %arg21[%c0_55, %c0_56] : memref<1x128xf32, #tpu.memory_space<vmem>>, vector<1x128xf32>
    %76 = vector.broadcast %75 : vector<1x128xf32> to vector<8x128xf32>
    %77 = arith.addf %74, %76 : vector<8x128xf32>
    %cst_57 = arith.constant 0.000000e+00 : f32
    %78 = vector.broadcast %cst_57 : f32 to vector<8x128xf32>
    %79 = arith.maximumf %77, %78 : vector<8x128xf32>
    %80 = arith.truncf %79 : vector<8x128xf32> to vector<8x128xbf16>
    %c0_58 = arith.constant 0 : index
    %c0_59 = arith.constant 0 : index
    %81 = vector.load %arg22[%c0_58, %c0_59] : memref<128x128xbf16, #tpu.memory_space<vmem>>, vector<128x128xbf16>
    %cst_60 = arith.constant dense<0.000000e+00> : vector<8x128xf32>
    %82 = tpu.matmul %80, %81, %cst_60 {dimension_numbers = #tpu.dot_dimension_numbers<[1], [0], [0], [1], [0, 0, 1, 1], [], []>} : vector<8x128xbf16>, vector<128x128xbf16>, vector<8x128xf32> -> vector<8x128xf32>
    %c0_61 = arith.constant 0 : index
    %c0_62 = arith.constant 0 : index
    %83 = vector.load %arg23[%c0_61, %c0_62] : memref<1x128xf32, #tpu.memory_space<vmem>>, vector<1x128xf32>
    %84 = vector.broadcast %83 : vector<1x128xf32> to vector<8x128xf32>
    %85 = arith.addf %82, %84 : vector<8x128xf32>
    %c0_63 = arith.constant 0 : index
    %c0_64 = arith.constant 0 : index
    %86 = vector.load %arg24[%c0_63, %c0_64] : memref<8x128xf32, #tpu.memory_space<vmem>>, vector<8x128xf32>
    tpu.vector_store %arg24[%c0_63, %c0_64], %85 {strides = array<i32>} : memref<8x128xf32, #tpu.memory_space<vmem>>, vector<8x128xf32>,
    return
  }
  func.func @transform_0(%arg0: i32) -> (i32, i32) {
    %c0_i32 = arith.constant 0 : i32
    %c0_i32_0 = arith.constant 0 : i32
    return %arg0, %c0_i32 : i32, i32
  }
  func.func @transform_1(%arg0: i32) -> (i32, i32) {
    %c0_i32 = arith.constant 0 : i32
    %c0_i32_0 = arith.constant 0 : i32
    return %arg0, %c0_i32 : i32, i32
  }
  func.func @transform_2(%arg0: i32) -> (i32, i32) {
    %c0_i32 = arith.constant 0 : i32
    %c0_i32_0 = arith.constant 0 : i32
    %c0_i32_1 = arith.constant 0 : i32
    return %c0_i32, %c0_i32_0 : i32, i32
  }
  func.func @transform_3(%arg0: i32) -> (i32, i32) {
    %c0_i32 = arith.constant 0 : i32
    %c0_i32_0 = arith.constant 0 : i32
    %c0_i32_1 = arith.constant 0 : i32
    return %c0_i32, %c0_i32_0 : i32, i32
  }
  func.func @transform_4(%arg0: i32) -> (i32, i32) {
    %c0_i32 = arith.constant 0 : i32
    %c0_i32_0 = arith.constant 0 : i32
    %c0_i32_1 = arith.constant 0 : i32
    return %c0_i32, %c0_i32_0 : i32, i32
  }
  func.func @transform_5(%arg0: i32) -> (i32, i32) {
    %c0_i32 = arith.constant 0 : i32
    %c0_i32_0 = arith.constant 0 : i32
    %c0_i32_1 = arith.constant 0 : i32
    return %c0_i32, %c0_i32_0 : i32, i32
  }
  func.func @transform_6(%arg0: i32) -> (i32, i32) {
    %c0_i32 = arith.constant 0 : i32
    %c0_i32_0 = arith.constant 0 : i32
    %c0_i32_1 = arith.constant 0 : i32
    return %c0_i32, %c0_i32_0 : i32, i32
  }
  func.func @transform_7(%arg0: i32) -> (i32, i32) {
    %c0_i32 = arith.constant 0 : i32
    %c0_i32_0 = arith.constant 0 : i32
    %c0_i32_1 = arith.constant 0 : i32
    return %c0_i32, %c0_i32_0 : i32, i32
  }
  func.func @transform_8(%arg0: i32) -> (i32, i32) {
    %c0_i32 = arith.constant 0 : i32
    %c0_i32_0 = arith.constant 0 : i32
    %c0_i32_1 = arith.constant 0 : i32
    return %c0_i32, %c0_i32_0 : i32, i32
  }
  func.func @transform_9(%arg0: i32) -> (i32, i32) {
    %c0_i32 = arith.constant 0 : i32
    %c0_i32_0 = arith.constant 0 : i32
    %c0_i32_1 = arith.constant 0 : i32
    return %c0_i32, %c0_i32_0 : i32, i32
  }
  func.func @transform_10(%arg0: i32) -> (i32, i32) {
    %c0_i32 = arith.constant 0 : i32
    %c0_i32_0 = arith.constant 0 : i32
    %c0_i32_1 = arith.constant 0 : i32
    return %c0_i32, %c0_i32_0 : i32, i32
  }
  func.func @transform_11(%arg0: i32) -> (i32, i32) {
    %c0_i32 = arith.constant 0 : i32
    %c0_i32_0 = arith.constant 0 : i32
    %c0_i32_1 = arith.constant 0 : i32
    return %c0_i32, %c0_i32_0 : i32, i32
  }
  func.func @transform_12(%arg0: i32) -> (i32, i32) {
    %c0_i32 = arith.constant 0 : i32
    %c0_i32_0 = arith.constant 0 : i32
    %c0_i32_1 = arith.constant 0 : i32
    return %c0_i32, %c0_i32_0 : i32, i32
  }
  func.func @transform_13(%arg0: i32) -> (i32, i32) {
    %c0_i32 = arith.constant 0 : i32
    %c0_i32_0 = arith.constant 0 : i32
    %c0_i32_1 = arith.constant 0 : i32
    return %c0_i32, %c0_i32_0 : i32, i32
  }
  func.func @transform_14(%arg0: i32) -> (i32, i32) {
    %c0_i32 = arith.constant 0 : i32
    %c0_i32_0 = arith.constant 0 : i32
    %c0_i32_1 = arith.constant 0 : i32
    return %c0_i32, %c0_i32_0 : i32, i32
  }
  func.func @transform_15(%arg0: i32) -> (i32, i32) {
    %c0_i32 = arith.constant 0 : i32
    %c0_i32_0 = arith.constant 0 : i32
    %c0_i32_1 = arith.constant 0 : i32
    return %c0_i32, %c0_i32_0 : i32, i32
  }
  func.func @transform_16(%arg0: i32) -> (i32, i32) {
    %c0_i32 = arith.constant 0 : i32
    %c0_i32_0 = arith.constant 0 : i32
    %c0_i32_1 = arith.constant 0 : i32
    return %c0_i32, %c0_i32_0 : i32, i32
  }
  func.func @transform_17(%arg0: i32) -> (i32, i32) {
    %c0_i32 = arith.constant 0 : i32
    %c0_i32_0 = arith.constant 0 : i32
    %c0_i32_1 = arith.constant 0 : i32
    return %c0_i32, %c0_i32_0 : i32, i32
  }
  func.func @transform_18(%arg0: i32) -> (i32, i32) {
    %c0_i32 = arith.constant 0 : i32
    %c0_i32_0 = arith.constant 0 : i32
    %c0_i32_1 = arith.constant 0 : i32
    return %c0_i32, %c0_i32_0 : i32, i32
  }
  func.func @transform_19(%arg0: i32) -> (i32, i32) {
    %c0_i32 = arith.constant 0 : i32
    %c0_i32_0 = arith.constant 0 : i32
    %c0_i32_1 = arith.constant 0 : i32
    return %c0_i32, %c0_i32_0 : i32, i32
  }
  func.func @transform_20(%arg0: i32) -> (i32, i32) {
    %c0_i32 = arith.constant 0 : i32
    %c0_i32_0 = arith.constant 0 : i32
    %c0_i32_1 = arith.constant 0 : i32
    return %c0_i32, %c0_i32_0 : i32, i32
  }
  func.func @transform_21(%arg0: i32) -> (i32, i32) {
    %c0_i32 = arith.constant 0 : i32
    %c0_i32_0 = arith.constant 0 : i32
    %c0_i32_1 = arith.constant 0 : i32
    return %c0_i32, %c0_i32_0 : i32, i32
  }
  func.func @transform_22(%arg0: i32) -> (i32, i32) {
    %c0_i32 = arith.constant 0 : i32
    %c0_i32_0 = arith.constant 0 : i32
    %c0_i32_1 = arith.constant 0 : i32
    return %c0_i32, %c0_i32_0 : i32, i32
  }
  func.func @transform_23(%arg0: i32) -> (i32, i32) {
    %c0_i32 = arith.constant 0 : i32
    %c0_i32_0 = arith.constant 0 : i32
    return %arg0, %c0_i32 : i32, i32
  }
}

</mosaic_0001>

<bundles_post_ra>
// kernel: mlp_network_large_forward.1
= control target key start
LH: loop header
LB: loop body
LE: loop exit
PB: predicated region body
PF: predicated region fallthrough
CT: control target
= control target key end

     0   :  { %v1806_v1 = vmov 0   ;;  %vm102_vm0 = vcmask 130048   ;;  %v1807_v6 = vmov 0.0   ;;  %vm172_vm1 = vcmask 1043456   ;;  %s2338_s2 = inlined_call_operand.vmem [shape: bf16[16,256], index: 2, kind: input, shape index: {}]   ;;  %s2339_s0 = inlined_call_operand.vmem [shape: f32[8,16], index: 0, kind: input, shape index: {}]   ;;  %s2340_s6 = inlined_call_operand.vmem [shape: bf16[128,128], index: 6, kind: input, shape index: {}]   ;;  %s2341_s4 = inlined_call_operand.vmem [shape: bf16[8,256], index: 4, kind: input, shape index: {}]   ;;  %s2342_s1 = inlined_call_operand.vmem [shape: f32[8,8], index: 1, kind: input, shape index: {}]   ;;  %s2343_s9 = inlined_call_operand.vmem [shape: bf16[128,128], index: 9, kind: input, shape index: {}]   ;;  %s2344_s8 = inlined_call_operand.vmem [shape: bf16[128,128], index: 8, kind: input, shape index: {}]   ;;  %s2345_s3 = inlined_call_operand.vmem [shape: f32[1,256], index: 3, kind: input, shape index: {}]   ;;  %s2346_s5 = inlined_call_operand.vmem [shape: f32[1,256], index: 5, kind: input, shape index: {}]   ;;  %s2347_s11 = inlined_call_operand.vmem [shape: bf16[128,128], index: 11, kind: input, shape index: {}]   ;;  %s2348_s7 = inlined_call_operand.vmem [shape: f32[1,128], index: 7, kind: input, shape index: {}]   ;;  %s2349_s16 = inlined_call_operand.vmem [shape: bf16[128,128], index: 16, kind: input, shape index: {}]   ;;  %s2350_s17 = inlined_call_operand.vmem [shape: bf16[128,128], index: 17, kind: input, shape index: {}]   ;;  %s2351_s13 = inlined_call_operand.vmem [shape: bf16[128,128], index: 13, kind: input, shape index: {}]   ;;  %s2352_s10 = inlined_call_operand.vmem [shape: f32[1,128], index: 10, kind: input, shape index: {}]   ;;  %s2353_s15 = inlined_call_operand.vmem [shape: bf16[128,128], index: 15, kind: input, shape index: {}]   ;;  %s2354_s12 = inlined_call_operand.vmem [shape: f32[1,128], index: 12, kind: input, shape index: {}]   ;;  %s2355_s19 = inlined_call_operand.vmem [shape: bf16[128,128], index: 19, kind: input, shape index: {}]   ;;  %s2356_s14 = inlined_call_operand.vmem [shape: f32[1,128], index: 14, kind: input, shape index: {}]   ;;  %s2357_s21 = inlined_call_operand.vmem [shape: bf16[128,128], index: 21, kind: input, shape index: {}]   ;;  %s2358_s18 = inlined_call_operand.vmem [shape: f32[1,128], index: 18, kind: input, shape index: {}]   ;;  %s2359_s20 = inlined_call_operand.vmem [shape: f32[1,128], index: 20, kind: input, shape index: {}]   ;;  %s2360_s22 = inlined_call_operand.vmem [shape: f32[1,128], index: 22, kind: input, shape index: {}]   ;;  %s2361_s23 = inlined_call_operand.vmem [shape: f32[8,128], index: 23, kind: output, shape index: {}]  }
   0x1   :  { %2366 = sst [smem:[#allocation2_spill]] %s2338_s2  ;;  %138 = vmatprep.mubr.bf16.mxu0 %v1806_v1  ;;  %211 = vmatprep.mubr.bf16.mxu1 %v1806_v1  ;;  %vm168_vm2 = vcmask 64512   ;;  %vm1808_vm3 = vmmov 0   ;;  %v82_v27 = vlaneseq  ;;  %v151_v45 = vld [vmem:[%s2346_s5] sm:$0x3]  ;;  %v1751_v61 = vld [vmem:[%s2347_s11 + $0x8] sm:$0xff]  }
   0x2   :  { %2367 = sst [smem:[#allocation3_spill]] %s2339_s0  ;;  %s2374_s24 = sld [smem:[#allocation2_spill]]  ;;  %v1750_v60 = vld [vmem:[%s2347_s11] sm:$0xff]   ;;  %v1752_v62 = vld [vmem:[%s2347_s11 + $0x10] sm:$0xff]   ;;  %v1753_v63 = vld [vmem:[%s2347_s11 + $0x18] sm:$0xff]  }
   0x3   :  { %2368 = sst [smem:[#allocation4_spill]] %s2340_s6  ;;  %s2375_s6 = sld [smem:[#allocation3_spill]]  ;;  %v2010_v28 = vshrl.u32 %v82_v27, 7  ;;  %v1755_v1 = vld [vmem:[%s2347_s11 + $0x28] sm:$0xff]  }
   0x4   :  { %2369 = sst [smem:[#allocation5_spill]] %s2341_s4 }
   0x5   :  { %2370 = sst [smem:[#allocation6_spill]] %s2342_s1  ;;  %v84_v29 = vsub.s32 0, %v2010_v28  ;;  %v88_v46 = vsub.s32 1, %v2010_v28 }
   0x6   :  { %2371 = sst [smem:[#allocation7_spill]] %s2343_s9  ;;  %s2378_s2 = sld [smem:[#allocation6_spill]] }
   0x7   :  { %2372 = sst [smem:[#allocation8_spill]] %s2344_s8  ;;  %s2377_s8 = sld [smem:[#allocation5_spill]]  ;;  %v156_v47 = vrot.slane %v151_v45, %v84_v29  ;;  %v160_v48 = vrot.slane %v151_v45, %v88_v46  ;;  %v1766_v45 = vld [vmem:[%s2350_s17] sm:$0xff]  }
   0x8   :  { %2373 = sst [smem:[#allocation9_spill]] %s2345_s3  ;;  %v1721_v0 = vld [vmem:[%s2374_s24 + $0x4] ss:$8 sps:$4 sm:$0xff]   ;;  %v1723_v2 = vld [vmem:[%s2374_s24] ss:$8 sps:$4 sm:$0xff]   ;;  %s2376_s3 = sld [smem:[#allocation4_spill]] }
   0x9   :  { %v75_v3 = vld [vmem:[%s2375_s6] sm:$0xff]  ;;  %106 = vmatprep.subr.bf16.mxu0 %v1721_v0  ;;  %s2379_s9 = sld [smem:[#allocation7_spill]]  ;;  %s2381_s6 = sld [smem:[#allocation8_spill]] }
   0xa   :  { %v77_v4 = vpack.c.bf16 %v75_v3, %v75_v3  ;;  %107 = vmatpush1.bf16.msra.mxu0 %v1723_v2  ;;  %v1754_v0 = vld [vmem:[%s2347_s11 + $0x20] sm:$0xff]  }
   0xb   :  { %1518 = vmatprep.subr.bf16.mxu0 %v1807_v6  ;;  %v1341_v2 = vld [vmem:[%s2348_s7] ss:$0 sm:$0xff] }
   0xc   :  { %v76_v17 = vld [vmem:[%s2378_s2] sm:$0xff] }
   0xd   :  { %1336 = vmatmul.mubr.msk.bf16.vlgmr.msra.gmra.mrb[0].mxu0 %vm102_vm0, %v77_v4  ;;  %v150_v12 = vld [vmem:[%s2377_s8] sm:$0xff]  ;;  %v149_v18 = vpack.c.bf16 %v76_v17, %v76_v17 }
   0xe   :  { %v1724_v5 = vld [vmem:[%s2376_s3] sm:$0xff]   ;;  %v1725_v7 = vld [vmem:[%s2376_s3 + $0x8] sm:$0xff]   ;;  %v1726_v8 = vld [vmem:[%s2376_s3 + $0x10] sm:$0xff]   ;;  %v1338_v13 = vcombine.high %v150_v12, %v150_v12  ;;  %v1337_v15 = vcombine.low %v150_v12, %v150_v12  ;;  %1534 = vmatprep.mubr.msk.bf16.mxu0 %vm1808_vm3, %v1807_v6 }
   0xf   :  { %1519 = vmatpush3.bf16.msra.mxu0 %v1724_v5  ;;  %v1727_v9 = vld [vmem:[%s2376_s3 + $0x18] sm:$0xff]   ;;  %v1728_v10 = vld [vmem:[%s2376_s3 + $0x20] sm:$0xff]   ;;  %v1729_v11 = vld [vmem:[%s2376_s3 + $0x28] sm:$0xff]  }
  0x10   :  { %1520 = vmatprep.subr.bf16.mxu0 %v1807_v6  ;;  %v1731_v14 = vld [vmem:[%s2376_s3 + $0x30] sm:$0xff]   ;;  %1339 = vmatprep.subr.msk.bf16.mxu1 %vm172_vm1, %v1338_v13  ;;  %v174_v16 = vsel %vm172_vm1, %v1337_v15, 0  ;;  %v1733_v19 = vld [vmem:[%s2376_s3 + $0x38] sm:$0xff]   ;;  %v1734_v20 = vld [vmem:[%s2379_s9] sm:$0xff]   ;;  %s2380_s3 = sld [smem:[#allocation9_spill]] }
  0x11   :  { %180 = vmatpush1.bf16.msra.mxu1 %v174_v16  ;;  %v1736_v21 = vld [vmem:[%s2379_s9 + $0x8] sm:$0xff]   ;;  %v1738_v22 = vld [vmem:[%s2379_s9 + $0x10] sm:$0xff]   ;;  %v1740_v23 = vld [vmem:[%s2379_s9 + $0x18] sm:$0xff]  }
  0x12   :  { %1538 = vmatprep.subr.bf16.mxu1 %v1807_v6  ;;  %v1742_v24 = vld [vmem:[%s2379_s9 + $0x20] sm:$0xff]   ;;  %v1744_v25 = vld [vmem:[%s2379_s9 + $0x28] sm:$0xff]   ;;  %v1746_v26 = vld [vmem:[%s2379_s9 + $0x30] sm:$0xff]  }
  0x13   :  { %1521 = vmatpush3.bf16.msra.mxu0 %v1725_v7  ;;  %v1735_v38 = vld [vmem:[%s2381_s6] sm:$0xff]   ;;  %v1737_v40 = vld [vmem:[%s2381_s6 + $0x8] sm:$0xff]   ;;  %v1739_v41 = vld [vmem:[%s2381_s6 + $0x10] sm:$0xff]  }
  0x14   :  { %1522 = vmatprep.subr.bf16.mxu0 %v1807_v6  ;;  %1340 = vmatmul.mubr.msk.bf16.vlgmr.msra.gmra.mrb[0].mxu1 %vm168_vm2, %v149_v18  ;;  %v1741_v42 = vld [vmem:[%s2381_s6 + $0x18] sm:$0xff]   ;;  %v1743_v43 = vld [vmem:[%s2381_s6 + $0x20] sm:$0xff]   ;;  %v1745_v44 = vld [vmem:[%s2381_s6 + $0x28] sm:$0xff]  }
  0x15   :  { %1554 = vmatprep.mubr.msk.bf16.mxu1 %vm1808_vm3, %v1807_v6  ;;  %1539 = vmatpush3.bf16.msra.mxu1 %v1734_v20  ;;  %v1747_v52 = vld [vmem:[%s2381_s6 + $0x30] sm:$0xff]   ;;  %v1748_v55 = vld [vmem:[%s2379_s9 + $0x38] sm:$0xff]   ;;  %v1774_v17 = vld [vmem:[%s2351_s13] sm:$0xff]  }
  0x16   :  { %1540 = vmatprep.subr.bf16.mxu1 %v1807_v6  ;;  %v2016_v30 = vld [vmem:[%s2380_s3] sm:$0x3]  ;;  %v1749_v59 = vld [vmem:[%s2381_s6 + $0x38] sm:$0xff]   ;;  %v1775_v18 = vld [vmem:[%s2351_s13 + $0x8] sm:$0xff]  }
  0x17   :  { %1523 = vmatpush3.bf16.msra.mxu0 %v1726_v8  ;;  %v85_v31 = vrot.slane %v2016_v30, %v84_v29  ;;  %v1757_v16 = vld [vmem:[%s2347_s11 + $0x38] sm:$0xff]  }
  0x18   :  { %1524 = vmatprep.subr.bf16.mxu0 %v1807_v6  ;;  %v1777_v20 = vld [vmem:[%s2351_s13 + $0x18] sm:$0xff]  }
  0x19   :  { %1541 = vmatpush3.bf16.msra.mxu1 %v1736_v21  ;;  %v1778_v21 = vld [vmem:[%s2351_s13 + $0x20] sm:$0xff]  }
  0x1a   :  { %1542 = vmatprep.subr.bf16.mxu1 %v1807_v6 }
  0x1b   :  { %1525 = vmatpush3.bf16.msra.mxu0 %v1727_v9 }
  0x1c   :  { %1526 = vmatprep.subr.bf16.mxu0 %v1807_v6 }
  0x1d   :  { %1543 = vmatpush3.bf16.msra.mxu1 %v1738_v22  ;;  %v1779_v22 = vld [vmem:[%s2351_s13 + $0x28] sm:$0xff]  }
  0x1e   :  { %1544 = vmatprep.subr.bf16.mxu1 %v1807_v6 }
  0x1f   :  { %1527 = vmatpush3.bf16.msra.mxu0 %v1728_v10 }
  0x20   :  { %1528 = vmatprep.subr.bf16.mxu0 %v1807_v6 }
  0x21   :  { %1545 = vmatpush3.bf16.msra.mxu1 %v1740_v23  ;;  %v1780_v23 = vld [vmem:[%s2351_s13 + $0x30] sm:$0xff]  }
  0x22   :  { %1546 = vmatprep.subr.bf16.mxu1 %v1807_v6 }
  0x23   :  { %1529 = vmatpush3.bf16.msra.mxu0 %v1729_v11 }
  0x24   :  { %1530 = vmatprep.subr.bf16.mxu0 %v1807_v6 }
  0x25   :  { %1547 = vmatpush3.bf16.msra.mxu1 %v1742_v24 }
  0x26   :  { %1548 = vmatprep.subr.bf16.mxu1 %v1807_v6 }
  0x27   :  { %1531 = vmatpush3.bf16.msra.mxu0 %v1731_v14  ;;  %v1756_v14 = vld [vmem:[%s2347_s11 + $0x30] sm:$0xff]  }
  0x28   :  { %1532 = vmatprep.subr.bf16.mxu0 %v1807_v6 }
  0x29   :  { %1549 = vmatpush3.bf16.msra.mxu1 %v1744_v25  ;;  %v1366_v25 = vld [vmem:[%s2352_s10] ss:$0 sm:$0xff] }
  0x2a   :  { %1550 = vmatprep.subr.bf16.mxu1 %v1807_v6 }
  0x2b   :  { %1533 = vmatpush3.bf16.msra.mxu0 %v1733_v19  ;;  %v1776_v19 = vld [vmem:[%s2351_s13 + $0x10] sm:$0xff]  }
  0x2c   :  { %1558 = vmatprep.subr.bf16.mxu0 %v1807_v6 }
  0x2d   :  { %1551 = vmatpush3.bf16.msra.mxu1 %v1746_v26 }
  0x2e   :  { %1552 = vmatprep.subr.bf16.mxu1 %v1807_v6 }
  0x31   :  { %1553 = vmatpush3.bf16.msra.mxu1 %v1748_v55 }
  0x32   :  { %1578 = vmatprep.subr.bf16.mxu1 %v1807_v6 }
  0xe0   :  { %v140_v32 = vpop.f32.mrb[0].mxu0 }
  0xe1   :  { %v141_v33 = vadd.f32 %v140_v32, %v85_v31  ;;  %v2019_v34 = vpop.f32.mrb[1].mxu0 }
  0xe2   :  { %v144_v35 = vpop.f32.mrb[2].mxu0 }
  0xe3   :  { %v147_v36 = vmax.f32 %v141_v33, 0.0  ;;  %v145_v37 = vpop.f32.mrb[3].mxu0  ;;  %v1758_v35 = vld [vmem:[%s2349_s16] sm:$0xff]  }
  0xe4   :  { %v1759_v37 = vld [vmem:[%s2349_s16 + $0x8] sm:$0xff]  }
  0xe5   :  { %v222_v39 = vpack.c.bf16 %v147_v36, %v147_v36 }
  0xe7   :  { %1535 = vmatmul.mubr.bf16.vlgmr.msra.gmra.mrb[4].mxu0 %v222_v39  ;;  %v213_v49 = vpop.f32.mrb[0].mxu1  ;;  %v1761_v39 = vld [vmem:[%s2349_s16 + $0x18] sm:$0xff]  }
  0xe8   :  { %1559 = vmatpush3.bf16.msra.mxu0 %v1735_v38  ;;  %1574 = vmatprep.mubr.msk.bf16.mxu0 %vm1808_vm3, %v1807_v6  ;;  %v214_v50 = vadd.f32 %v213_v49, %v156_v47  ;;  %v215_v51 = vpop.f32.mrb[1].mxu1  ;;  %v1760_v38 = vld [vmem:[%s2349_s16 + $0x10] sm:$0xff]  }
  0xe9   :  { %1560 = vmatprep.subr.bf16.mxu0 %v1807_v6  ;;  %v2056_v53 = vadd.f32 %v215_v51, %v160_v48  ;;  %v217_v54 = vpop.f32.mrb[2].mxu1  ;;  %v1767_v48 = vld [vmem:[%s2350_s17 + $0x8] sm:$0xff]   ;;  %v1768_v49 = vld [vmem:[%s2350_s17 + $0x10] sm:$0xff]   ;;  %v1770_v51 = vld [vmem:[%s2350_s17 + $0x20] sm:$0xff]  }
  0xea   :  { %v220_v56 = vmax.f32 %v214_v50, 0.0  ;;  %v218_v57 = vpop.f32.mrb[3].mxu1  ;;  %v1769_v50 = vld [vmem:[%s2350_s17 + $0x18] sm:$0xff]   ;;  %v1772_v54 = vld [vmem:[%s2350_s17 + $0x30] sm:$0xff]  }
  0xec   :  { %1561 = vmatpush3.bf16.msra.mxu0 %v1737_v40  ;;  %v352_v58 = vpack.c.bf16 %v220_v56, %v220_v56  ;;  %v1762_v40 = vld [vmem:[%s2349_s16 + $0x20] sm:$0xff]   ;;  %v1773_v56 = vld [vmem:[%s2350_s17 + $0x38] sm:$0xff]  }
  0xed   :  { %1562 = vmatprep.subr.bf16.mxu0 %v1807_v6 }
  0xee   :  { %1555 = vmatmul.mubr.bf16.vlgmr.msra.gmra.mrb[4].mxu1 %v352_v58 }
  0xef   :  { %1594 = vmatprep.mubr.msk.bf16.mxu1 %vm1808_vm3, %v1807_v6  ;;  %1579 = vmatpush3.bf16.msra.mxu1 %v1750_v60 }
  0xf0   :  { %1563 = vmatpush3.bf16.msra.mxu0 %v1739_v41  ;;  %1580 = vmatprep.subr.bf16.mxu1 %v1807_v6  ;;  %v1763_v41 = vld [vmem:[%s2349_s16 + $0x28] sm:$0xff]  }
  0xf1   :  { %1564 = vmatprep.subr.bf16.mxu0 %v1807_v6 }
  0xf3   :  { %1581 = vmatpush3.bf16.msra.mxu1 %v1751_v61  ;;  %v1782_v61 = vld [vmem:[%s2353_s15] sm:$0xff]  }
  0xf4   :  { %1565 = vmatpush3.bf16.msra.mxu0 %v1741_v42  ;;  %1582 = vmatprep.subr.bf16.mxu1 %v1807_v6  ;;  %v1764_v42 = vld [vmem:[%s2349_s16 + $0x30] sm:$0xff]  }
  0xf5   :  { %1566 = vmatprep.subr.bf16.mxu0 %v1807_v6 }
  0xf7   :  { %1583 = vmatpush3.bf16.msra.mxu1 %v1752_v62 }
  0xf8   :  { %1567 = vmatpush3.bf16.msra.mxu0 %v1743_v43  ;;  %1584 = vmatprep.subr.bf16.mxu1 %v1807_v6  ;;  %v1765_v43 = vld [vmem:[%s2349_s16 + $0x38] sm:$0xff]  }
  0xf9   :  { %1568 = vmatprep.subr.bf16.mxu0 %v1807_v6 }
  0xfb   :  { %1585 = vmatpush3.bf16.msra.mxu1 %v1753_v63 }
  0xfc   :  { %1569 = vmatpush3.bf16.msra.mxu0 %v1745_v44  ;;  %1586 = vmatprep.subr.bf16.mxu1 %v1807_v6  ;;  %v221_v44 = vmax.f32 %v2056_v53, 0.0  ;;  %v89_v53 = vrot.slane %v2016_v30, %v88_v46  ;;  %v1781_v30 = vld [vmem:[%s2351_s13 + $0x38] sm:$0xff]  }
  0xfd   :  { %1570 = vmatprep.subr.bf16.mxu0 %v1807_v6 }
  0xfe   :  { %v796_v47 = vpack.c.bf16 %v221_v44, %v221_v44  ;;  %v143_v55 = vadd.f32 %v2019_v34, %v89_v53  ;;  %v1367_v34 = vld [vmem:[%s2354_s12] ss:$0 sm:$0xff]  ;;  %v1805_v53 = vld [vmem:[%s2357_s21 + $0x38] sm:$0xff]  }
  0xff   :  { %1587 = vmatpush3.bf16.msra.mxu1 %v1754_v0  ;;  %v1783_v0 = vld [vmem:[%s2353_s15 + $0x8] sm:$0xff]   ;;  %v1409_v44 = vld [vmem:[%s2358_s18] ss:$0 sm:$0xff] }
 0x100   :  { %1571 = vmatpush3.bf16.msra.mxu0 %v1747_v52  ;;  %1588 = vmatprep.subr.bf16.mxu1 %v1807_v6  ;;  %v1771_v52 = vld [vmem:[%s2350_s17 + $0x28] sm:$0xff]   ;;  %v148_v57 = vmax.f32 %v143_v55, 0.0 }
 0x101   :  { %1572 = vmatprep.subr.bf16.mxu0 %v1807_v6 }
 0x102   :  { %v989_v28 = vpack.c.bf16 %v148_v57, %v148_v57 }
 0x103   :  { %1589 = vmatpush3.bf16.msra.mxu1 %v1755_v1  ;;  %v1784_v1 = vld [vmem:[%s2353_s15 + $0x10] sm:$0xff]  }
 0x104   :  { %1573 = vmatpush3.bf16.msra.mxu0 %v1749_v59  ;;  %1590 = vmatprep.subr.bf16.mxu1 %v1807_v6 }
 0x105   :  { %1598 = vmatprep.subr.bf16.mxu0 %v1807_v6 }
 0x107   :  { %1591 = vmatpush3.bf16.msra.mxu1 %v1756_v14  ;;  %v1788_v14 = vld [vmem:[%s2353_s15 + $0x30] sm:$0xff]  }
 0x108   :  { %1592 = vmatprep.subr.bf16.mxu1 %v1807_v6 }
 0x10b   :  { %1593 = vmatpush3.bf16.msra.mxu1 %v1757_v16  ;;  %v1376_v16 = vld [vmem:[%s2356_s14] ss:$0 sm:$0xff] }
 0x10c   :  { %1618 = vmatprep.subr.bf16.mxu1 %v1807_v6 }
 0x1ba   :  { %v328_v3 = vpop.f32.mrb[4].mxu0 }
 0x1bb   :  { %v329_v4 = vadd.f32 %v1341_v2, %v328_v3  ;;  %v1536_v5 = vpop.f32.mrb[5].mxu0  ;;  %v1785_v2 = vld [vmem:[%s2353_s15 + $0x18] sm:$0xff]   ;;  %v1786_v3 = vld [vmem:[%s2353_s15 + $0x20] sm:$0xff]  }
 0x1bc   :  { %v331_v7 = vpop.f32.mrb[6].mxu0 }
 0x1bd   :  { %v334_v8 = vmax.f32 %v329_v4, 0.0  ;;  %v1537_v9 = vpop.f32.mrb[7].mxu0  ;;  %v1787_v4 = vld [vmem:[%s2353_s15 + $0x28] sm:$0xff]  }
 0x1bf   :  { %v335_v10 = vpack.c.bf16 %v334_v8, %v334_v8 }
 0x1c1   :  { %1575 = vmatmul.mubr.bf16.vlgmr.msra.gmra.mrb[8].mxu0 %v335_v10  ;;  %v451_v11 = vpop.f32.mrb[4].mxu1 }
 0x1c2   :  { %1614 = vmatprep.mubr.msk.bf16.mxu0 %vm1808_vm3, %v1807_v6  ;;  %v1556_v12 = vpop.f32.mrb[5].mxu1  ;;  %1599 = vmatpush3.bf16.msra.mxu0 %v1774_v17 }
 0x1c3   :  { %v454_v13 = vpop.f32.mrb[6].mxu1  ;;  %1600 = vmatprep.subr.bf16.mxu0 %v1807_v6 }
 0x1c4   :  { %v1557_v15 = vpop.f32.mrb[7].mxu1 }
 0x1c5   :  { %v1789_v15 = vld [vmem:[%s2353_s15 + $0x38] sm:$0xff]  }
 0x1c6   :  { %1601 = vmatpush3.bf16.msra.mxu0 %v1775_v18 }
 0x1c7   :  { %1602 = vmatprep.subr.bf16.mxu0 %v1807_v6 }
 0x1ca   :  { %1603 = vmatpush3.bf16.msra.mxu0 %v1776_v19 }
 0x1cb   :  { %1604 = vmatprep.subr.bf16.mxu0 %v1807_v6 }
 0x1ce   :  { %1605 = vmatpush3.bf16.msra.mxu0 %v1777_v20 }
 0x1cf   :  { %1606 = vmatprep.subr.bf16.mxu0 %v1807_v6 }
 0x1d2   :  { %1607 = vmatpush3.bf16.msra.mxu0 %v1778_v21 }
 0x1d3   :  { %1608 = vmatprep.subr.bf16.mxu0 %v1807_v6 }
 0x1d6   :  { %1609 = vmatpush3.bf16.msra.mxu0 %v1779_v22 }
 0x1d7   :  { %1610 = vmatprep.subr.bf16.mxu0 %v1807_v6 }
 0x1da   :  { %1611 = vmatpush3.bf16.msra.mxu0 %v1780_v23  ;;  %v1790_v23 = vld [vmem:[%s2355_s19] sm:$0xff]  }
 0x1db   :  { %1612 = vmatprep.subr.bf16.mxu0 %v1807_v6 }
 0x1de   :  { %1613 = vmatpush3.bf16.msra.mxu0 %v1781_v30 }
 0x1df   :  { %1638 = vmatprep.subr.bf16.mxu0 %v1807_v6 }
 0x294   :  { %v539_v24 = vpop.f32.mrb[8].mxu0 }
 0x295   :  { %v540_v26 = vadd.f32 %v539_v24, %v451_v11  ;;  %v1576_v27 = vpop.f32.mrb[9].mxu0 }
 0x296   :  { %v542_v29 = vpop.f32.mrb[10].mxu0  ;;  %v1793_v27 = vld [vmem:[%s2355_s19 + $0x18] sm:$0xff]  }
 0x297   :  { %v552_v31 = vadd.f32 %v1366_v25, %v540_v26  ;;  %v1577_v32 = vpop.f32.mrb[11].mxu0  ;;  %v1791_v25 = vld [vmem:[%s2355_s19 + $0x8] sm:$0xff]   ;;  %v1792_v26 = vld [vmem:[%s2355_s19 + $0x10] sm:$0xff]   ;;  %v1794_v29 = vld [vmem:[%s2355_s19 + $0x20] sm:$0xff]  }
 0x298   :  { %v1796_v32 = vld [vmem:[%s2355_s19 + $0x30] sm:$0xff]  }
 0x299   :  { %v553_v33 = vmax.f32 %v552_v31, 0.0  ;;  %v1795_v31 = vld [vmem:[%s2355_s19 + $0x28] sm:$0xff]  }
 0x29b   :  { %v554_v36 = vpack.c.bf16 %v553_v33, %v553_v33  ;;  %v1797_v33 = vld [vmem:[%s2355_s19 + $0x38] sm:$0xff]  }
 0x29d   :  { %1595 = vmatmul.mubr.bf16.vlgmr.msra.gmra.mrb[8].mxu1 %v554_v36  ;;  %v1799_v36 = vld [vmem:[%s2357_s21 + $0x8] sm:$0xff]  }
 0x29e   :  { %1619 = vmatpush3.bf16.msra.mxu1 %v1758_v35  ;;  %1634 = vmatprep.mubr.msk.bf16.mxu1 %vm1808_vm3, %v1807_v6  ;;  %v1798_v35 = vld [vmem:[%s2357_s21] sm:$0xff]  }
 0x29f   :  { %1620 = vmatprep.subr.bf16.mxu1 %v1807_v6 }
 0x2a2   :  { %1621 = vmatpush3.bf16.msra.mxu1 %v1759_v37  ;;  %v1800_v37 = vld [vmem:[%s2357_s21 + $0x10] sm:$0xff]  }
 0x2a3   :  { %1622 = vmatprep.subr.bf16.mxu1 %v1807_v6 }
 0x2a6   :  { %1623 = vmatpush3.bf16.msra.mxu1 %v1760_v38  ;;  %v1801_v38 = vld [vmem:[%s2357_s21 + $0x18] sm:$0xff]  }
 0x2a7   :  { %1624 = vmatprep.subr.bf16.mxu1 %v1807_v6 }
 0x2aa   :  { %1625 = vmatpush3.bf16.msra.mxu1 %v1761_v39  ;;  %v1802_v39 = vld [vmem:[%s2357_s21 + $0x20] sm:$0xff]  }
 0x2ab   :  { %1626 = vmatprep.subr.bf16.mxu1 %v1807_v6 }
 0x2ae   :  { %1627 = vmatpush3.bf16.msra.mxu1 %v1762_v40  ;;  %v1803_v40 = vld [vmem:[%s2357_s21 + $0x28] sm:$0xff]  }
 0x2af   :  { %1628 = vmatprep.subr.bf16.mxu1 %v1807_v6 }
 0x2b2   :  { %1629 = vmatpush3.bf16.msra.mxu1 %v1763_v41 }
 0x2b3   :  { %1630 = vmatprep.subr.bf16.mxu1 %v1807_v6 }
 0x2b6   :  { %1631 = vmatpush3.bf16.msra.mxu1 %v1764_v42 }
 0x2b7   :  { %1632 = vmatprep.subr.bf16.mxu1 %v1807_v6 }
 0x2ba   :  { %1633 = vmatpush3.bf16.msra.mxu1 %v1765_v43 }
 0x2bb   :  { %1658 = vmatprep.subr.bf16.mxu1 %v1807_v6 }
 0x2bd   :  { %1635 = vmatmul.mubr.bf16.vlgmr.msra.gmra.mrb[12].mxu1 %v796_v47 }
 0x2be   :  { %1659 = vmatpush3.bf16.msra.mxu1 %v1766_v45  ;;  %1674 = vmatprep.mubr.msk.bf16.mxu1 %vm1808_vm3, %v1807_v6 }
 0x2bf   :  { %1660 = vmatprep.subr.bf16.mxu1 %v1807_v6 }
 0x2c2   :  { %1661 = vmatpush3.bf16.msra.mxu1 %v1767_v48 }
 0x2c3   :  { %1662 = vmatprep.subr.bf16.mxu1 %v1807_v6 }
 0x2c6   :  { %1663 = vmatpush3.bf16.msra.mxu1 %v1768_v49 }
 0x2c7   :  { %1664 = vmatprep.subr.bf16.mxu1 %v1807_v6 }
 0x2ca   :  { %1665 = vmatpush3.bf16.msra.mxu1 %v1769_v50 }
 0x2cb   :  { %1666 = vmatprep.subr.bf16.mxu1 %v1807_v6 }
 0x2ce   :  { %1667 = vmatpush3.bf16.msra.mxu1 %v1770_v51 }
 0x2cf   :  { %1668 = vmatprep.subr.bf16.mxu1 %v1807_v6 }
 0x2d2   :  { %1669 = vmatpush3.bf16.msra.mxu1 %v1771_v52  ;;  %v1804_v52 = vld [vmem:[%s2357_s21 + $0x30] sm:$0xff]  }
 0x2d3   :  { %1670 = vmatprep.subr.bf16.mxu1 %v1807_v6 }
 0x2d6   :  { %1671 = vmatpush3.bf16.msra.mxu1 %v1772_v54  ;;  %v1410_v54 = vld [vmem:[%s2359_s20] ss:$0 sm:$0xff] }
 0x2d7   :  { %1672 = vmatprep.subr.bf16.mxu1 %v1807_v6 }
 0x2da   :  { %1673 = vmatpush3.bf16.msra.mxu1 %v1773_v56 }
 0x2db   :  { %1698 = vmatprep.subr.bf16.mxu1 %v1807_v6 }
 0x2dd   :  { %1675 = vmatmul.mubr.bf16.vlgmr.msra.gmra.mrb[16].mxu1 %v989_v28 }
 0x2de   :  { %1714 = vmatprep.mubr.msk.bf16.mxu1 %vm1808_vm3, %v1807_v6  ;;  %1699 = vmatpush3.bf16.msra.mxu1 %v1798_v35 }
 0x2df   :  { %1700 = vmatprep.subr.bf16.mxu1 %v1807_v6 }
 0x2e2   :  { %1701 = vmatpush3.bf16.msra.mxu1 %v1799_v36 }
 0x2e3   :  { %1702 = vmatprep.subr.bf16.mxu1 %v1807_v6 }
 0x2e6   :  { %1703 = vmatpush3.bf16.msra.mxu1 %v1800_v37 }
 0x2e7   :  { %1704 = vmatprep.subr.bf16.mxu1 %v1807_v6 }
 0x2ea   :  { %1705 = vmatpush3.bf16.msra.mxu1 %v1801_v38 }
 0x2eb   :  { %1706 = vmatprep.subr.bf16.mxu1 %v1807_v6 }
 0x2ee   :  { %1707 = vmatpush3.bf16.msra.mxu1 %v1802_v39 }
 0x2ef   :  { %1708 = vmatprep.subr.bf16.mxu1 %v1807_v6 }
 0x2f2   :  { %1709 = vmatpush3.bf16.msra.mxu1 %v1803_v40 }
 0x2f3   :  { %1710 = vmatprep.subr.bf16.mxu1 %v1807_v6 }
 0x2f6   :  { %1711 = vmatpush3.bf16.msra.mxu1 %v1804_v52 }
 0x2f7   :  { %1712 = vmatprep.subr.bf16.mxu1 %v1807_v6 }
 0x2fa   :  { %1713 = vmatpush3.bf16.msra.mxu1 %v1805_v53 }
 0x370   :  { %v660_v46 = vpop.f32.mrb[8].mxu1 }
 0x371   :  { %v661_v58 = vadd.f32 %v1367_v34, %v660_v46  ;;  %v1596_v59 = vpop.f32.mrb[9].mxu1 }
 0x372   :  { %v663_v60 = vpop.f32.mrb[10].mxu1 }
 0x373   :  { %v666_v62 = vpack.c.bf16 %v661_v58, %v661_v58  ;;  %v1597_v63 = vpop.f32.mrb[11].mxu1 }
 0x375   :  { %1615 = vmatmul.mubr.bf16.vlgmr.msra.gmra.mrb[12].mxu0 %v666_v62 }
 0x376   :  { %1639 = vmatpush3.bf16.msra.mxu0 %v1782_v61  ;;  %1654 = vmatprep.mubr.msk.bf16.mxu0 %vm1808_vm3, %v1807_v6 }
 0x377   :  { %1640 = vmatprep.subr.bf16.mxu0 %v1807_v6 }
 0x37a   :  { %1641 = vmatpush3.bf16.msra.mxu0 %v1783_v0 }
 0x37b   :  { %1642 = vmatprep.subr.bf16.mxu0 %v1807_v6 }
 0x37e   :  { %1643 = vmatpush3.bf16.msra.mxu0 %v1784_v1 }
 0x37f   :  { %1644 = vmatprep.subr.bf16.mxu0 %v1807_v6 }
 0x382   :  { %1645 = vmatpush3.bf16.msra.mxu0 %v1785_v2 }
 0x383   :  { %1646 = vmatprep.subr.bf16.mxu0 %v1807_v6 }
 0x386   :  { %1647 = vmatpush3.bf16.msra.mxu0 %v1786_v3 }
 0x387   :  { %1648 = vmatprep.subr.bf16.mxu0 %v1807_v6 }
 0x38a   :  { %1649 = vmatpush3.bf16.msra.mxu0 %v1787_v4 }
 0x38b   :  { %1650 = vmatprep.subr.bf16.mxu0 %v1807_v6 }
 0x38e   :  { %1651 = vmatpush3.bf16.msra.mxu0 %v1788_v14 }
 0x38f   :  { %1652 = vmatprep.subr.bf16.mxu0 %v1807_v6 }
 0x390   :  { %v2245_v5 = vpop.f32.mrb[12].mxu1 }
 0x391   :  { %v1636_v7 = vpop.f32.mrb[13].mxu1 }
 0x392   :  { %v898_v8 = vpop.f32.mrb[14].mxu1  ;;  %1653 = vmatpush3.bf16.msra.mxu0 %v1789_v15 }
 0x393   :  { %v1637_v9 = vpop.f32.mrb[15].mxu1  ;;  %1678 = vmatprep.subr.bf16.mxu0 %v1807_v6 }
 0x3b0   :  { %v2247_v10 = vpop.f32.mrb[16].mxu1 }
 0x3b1   :  { %v1676_v11 = vpop.f32.mrb[17].mxu1 }
 0x3b2   :  { %v1091_v12 = vpop.f32.mrb[18].mxu1 }
 0x3b3   :  { %v1677_v13 = vpop.f32.mrb[19].mxu1 }
 0x448   :  { %v772_v17 = vpop.f32.mrb[12].mxu0 }
 0x449   :  { %v773_v18 = vadd.f32 %v1376_v16, %v772_v17  ;;  %v1616_v19 = vpop.f32.mrb[13].mxu0 }
 0x44a   :  { %v775_v20 = vpop.f32.mrb[14].mxu0 }
 0x44b   :  { %v778_v21 = vmax.f32 %v773_v18, 0.0  ;;  %v1617_v22 = vpop.f32.mrb[15].mxu0 }
 0x44d   :  { %v779_v24 = vpack.c.bf16 %v778_v21, %v778_v21 }
 0x44f   :  { %1655 = vmatmul.mubr.bf16.vlgmr.msra.gmra.mrb[16].mxu0 %v779_v24 }
 0x450   :  { %1679 = vmatpush3.bf16.msra.mxu0 %v1790_v23  ;;  %1694 = vmatprep.mubr.msk.bf16.mxu0 %vm1808_vm3, %v1807_v6 }
 0x451   :  { %1680 = vmatprep.subr.bf16.mxu0 %v1807_v6 }
 0x454   :  { %1681 = vmatpush3.bf16.msra.mxu0 %v1791_v25 }
 0x455   :  { %1682 = vmatprep.subr.bf16.mxu0 %v1807_v6 }
 0x458   :  { %1683 = vmatpush3.bf16.msra.mxu0 %v1792_v26 }
 0x459   :  { %1684 = vmatprep.subr.bf16.mxu0 %v1807_v6 }
 0x45c   :  { %1685 = vmatpush3.bf16.msra.mxu0 %v1793_v27 }
 0x45d   :  { %1686 = vmatprep.subr.bf16.mxu0 %v1807_v6 }
 0x460   :  { %1687 = vmatpush3.bf16.msra.mxu0 %v1794_v29 }
 0x461   :  { %1688 = vmatprep.subr.bf16.mxu0 %v1807_v6 }
 0x464   :  { %1689 = vmatpush3.bf16.msra.mxu0 %v1795_v31 }
 0x465   :  { %1690 = vmatprep.subr.bf16.mxu0 %v1807_v6 }
 0x468   :  { %1691 = vmatpush3.bf16.msra.mxu0 %v1796_v32 }
 0x469   :  { %1692 = vmatprep.subr.bf16.mxu0 %v1807_v6  ;;  %v1419_v6 = vld [vmem:[%s2360_s22] ss:$0 sm:$0xff] }
 0x46c   :  { %1693 = vmatpush3.bf16.msra.mxu0 %v1797_v33 }
 0x522   :  { %v983_v41 = vpop.f32.mrb[16].mxu0 }
 0x523   :  { %v984_v42 = vadd.f32 %v983_v41, %v2245_v5  ;;  %v1656_v43 = vpop.f32.mrb[17].mxu0 }
 0x524   :  { %v986_v45 = vpop.f32.mrb[18].mxu0 }
 0x525   :  { %v1094_v47 = vadd.f32 %v2247_v10, %v984_v42  ;;  %v1657_v48 = vpop.f32.mrb[19].mxu0 }
 0x527   :  { %v1102_v49 = vadd.f32 %v1409_v44, %v1094_v47 }
 0x529   :  { %v1103_v50 = vmax.f32 %v1102_v49, 0.0 }
 0x52b   :  { %v1104_v51 = vpack.c.bf16 %v1103_v50, %v1103_v50 }
 0x52d   :  { %1695 = vmatmul.mubr.bf16.vlgmr.msra.gmra.mrb[20].mxu0 %v1104_v51 }
 0x600   :  { %v1210_v55 = vpop.f32.mrb[20].mxu0 }
 0x601   :  { %v1211_v56 = vadd.f32 %v1410_v54, %v1210_v55  ;;  %v1696_v57 = vpop.f32.mrb[21].mxu0 }
 0x602   :  { %v1213_v28 = vpop.f32.mrb[22].mxu0 }
 0x603   :  { %v1216_v30 = vmax.f32 %v1211_v56, 0.0  ;;  %v1697_v34 = vpop.f32.mrb[23].mxu0 }
 0x605   :  { %v1217_v46 = vpack.c.bf16 %v1216_v30, %v1216_v30 }
 0x607   :  { %1715 = vmatmul.mubr.bf16.vlgmr.msra.gmra.mrb[20].mxu1 %v1217_v46 }
 0x6da   :  { %v1323_v58 = vpop.f32.mrb[20].mxu1 }
 0x6db   :  { %v1324_v59 = vadd.f32 %v1419_v6, %v1323_v58  ;;  %v1716_v60 = vpop.f32.mrb[21].mxu1 }
 0x6dc   :  { %v1326_v61 = vpop.f32.mrb[22].mxu1 }
 0x6dd   :  { %1329 = vst [vmem:[%s2361_s23] sm:$0xff] %v1324_v59  ;;  %v1717_v62 = vpop.f32.mrb[23].mxu1 }

</bundles_post_ra>
